<compile_context>
chip_gen: v5e
topology: v5e:2x2
jax: 0.10.0
libtpu: 0.0.40
codegen_flags: <defaults>
</compile_context>

<pallas_src>
import functools

import jax
import jax.numpy as jnp
from jax.experimental import pallas as pl
from jax.experimental.pallas import tpu as pltpu


def _round_up(n, m):
    return ((n + m - 1) // m) * m


def make_mlp(obs_dim, hidden, num_actions, *, max_tile=2048):
    """Returns (pack_params, forward).

    pack_params(w1, b1, w2, b2): weights in native PyTorch layout
        w1: (hidden, obs_dim), b1: (hidden,), w2: (num_actions, hidden),
        b2: (num_actions,)  ->  one (rows, 128)-aligned f32 slab.  Call ONCE.

    forward(x, packed): x is (batch, obs_dim); returns (batch, num_actions).
    """
    D, H, A = obs_dim, hidden, num_actions

    # Row offsets of each section inside the packed slab (8-sublane aligned).
    r_w1 = 0                                 # (H, D)
    r_b1 = _round_up(r_w1 + H, 8)            # (H, 1)  bias as a column -> lane bcast
    r_w2 = _round_up(r_b1 + H, 8)            # (A, H)
    r_b2 = _round_up(r_w2 + A, 8)            # (A, 1)
    rows = _round_up(r_b2 + A, 8)
    cols = _round_up(max(D, H, 1), 128)      # lane-aligned slab width

    def pack_params(w1, b1, w2, b2):
        p = jnp.zeros((rows, cols), jnp.float32)
        p = p.at[r_w1:r_w1 + H, :D].set(jnp.asarray(w1, jnp.float32))
        p = p.at[r_b1:r_b1 + H, 0:1].set(jnp.asarray(b1, jnp.float32).reshape(H, 1))
        p = p.at[r_w2:r_w2 + A, :H].set(jnp.asarray(w2, jnp.float32))
        p = p.at[r_b2:r_b2 + A, 0:1].set(jnp.asarray(b2, jnp.float32).reshape(A, 1))
        return p

    def kernel(xT_ref, p_ref, oT_ref):
        # Static slices into the VMEM-resident packed parameter slab.
        w1 = p_ref[r_w1:r_w1 + H, :D]        # (H, D)
        b1 = p_ref[r_b1:r_b1 + H, 0:1]       # (H, 1) broadcasts along lanes (batch)
        w2 = p_ref[r_w2:r_w2 + A, :H]        # (A, H)
        b2 = p_ref[r_b2:r_b2 + A, 0:1]       # (A, 1)

        # Hidden: (H, D) @ (D, TB) + (H, 1) -> ReLU
        h = jnp.dot(w1, xT_ref[...], preferred_element_type=jnp.float32) + b1
        h = jnp.maximum(h, 0.0)
        # Output: (A, H) @ (H, TB) + (A, 1)   -- lane-dense (A, TB) store.
        out = jnp.dot(w2, h, preferred_element_type=jnp.float32) + b2
        oT_ref[...] = out.astype(oT_ref.dtype)

    @jax.jit
    def forward(x, packed):
        B = x.shape[0]
        # Batch lives on the lane axis: pad it to a multiple of 128 lanes and
        # use one grid step whenever it fits a single tile.
        if B <= max_tile:
            tb = _round_up(B, 128)
            bp = tb
        else:
            tb = max_tile
            bp = _round_up(B, tb)

        xT = jnp.asarray(x, jnp.float32).T            # (D, B) -- layout plumbing
        if bp != B:
            xT = jnp.pad(xT, ((0, 0), (0, bp - B)))

        outT = pl.pallas_call(
            kernel,
            out_shape=jax.ShapeDtypeStruct((A, bp), jnp.float32),
            grid_spec=pltpu.PrefetchScalarGridSpec(
                num_scalar_prefetch=0,
                grid=(bp // tb,),
                in_specs=[
                    # x^T tile pipelined along the batch (lane) axis.
                    pl.BlockSpec((D, tb), lambda i: (0, i)),
                    # Packed params: same block every step -> stays in VMEM.
                    pl.BlockSpec((rows, cols), lambda i: (0, 0)),
                ],
                out_specs=pl.BlockSpec((A, tb), lambda i: (0, i)),
            ),
            compiler_params=pltpu.CompilerParams(
                dimension_semantics=("arbitrary",),
            ),
        )(xT, packed)
        return outT[:, :B].T                           # (B, A)

    return pack_params, forward


if __name__ == "__main__":
    # Module config: flat observation of dim 16, hidden=32 (fixed by module), 4 actions.
    obs_dim = 16
    hidden = 32
    num_actions = 4
    batch = 256   # multiple of 128 -> lane-dense, single grid step

    key = jax.random.PRNGKey(0)
    kx, kw1, kb1, kw2, kb2 = jax.random.split(key, 5)

    x = jax.random.normal(kx, (batch, obs_dim), dtype=jnp.float32)

    # Parameters in native PyTorch Linear layout: W is (out, in), y = x @ W^T + b.
    bound1 = 1.0 / jnp.sqrt(obs_dim)
    w1 = jax.random.uniform(kw1, (hidden, obs_dim), jnp.float32, -bound1, bound1)
    b1 = jax.random.uniform(kb1, (hidden,), jnp.float32, -bound1, bound1)
    bound2 = 1.0 / jnp.sqrt(hidden)
    w2 = jax.random.uniform(kw2, (num_actions, hidden), jnp.float32, -bound2, bound2)
    b2 = jax.random.uniform(kb2, (num_actions,), jnp.float32, -bound2, bound2)

    pack_params, forward = make_mlp(obs_dim, hidden, num_actions)

    # Pack once at init (outside the per-call jitted forward).
    packed = jax.block_until_ready(pack_params(w1, b1, w2, b2))

    out = forward(x, packed)
    jax.block_until_ready(out)

    # Reference check in plain JAX (PyTorch Linear semantics).
    ref = jnp.maximum(x @ w1.T + b1, 0.0) @ w2.T + b2
    assert out.shape == (batch, num_actions)
    assert jnp.allclose(out, ref, atol=1e-5), "mismatch vs reference"

    # TODO(synk): optim.Adam in the module is training-only state, not part of forward.
    print("KERNEL_OK")
</pallas_src>

<mosaic_0001>
module attributes {stable_mosaic.version = 11 : i64} {
  func.func @kernel(%arg0: i32, %arg1: memref<16x256xf32, #tpu.memory_space<vmem>>, %arg2: memref<80x128xf32, #tpu.memory_space<vmem>>, %arg3: memref<4x256xf32, #tpu.memory_space<vmem>>) attributes {dimension_semantics = [#tpu.dimension_semantics<arbitrary>], iteration_bounds = array<i64: 1>, scalar_prefetch = 0 : i64, scratch_operands = 0 : i64, tpu.core_type = #tpu.core_type<tc>, window_params = [{transform_indices = @transform_0, window_bounds = array<i64: 16, 256>}, {pipeline_mode = #tpu.pipeline_mode<synchronous>, transform_indices = @transform_1, window_bounds = array<i64: 80, 128>}, {transform_indices = @transform_2, window_bounds = array<i64: 4, 256>}]} {
    %c0 = arith.constant 0 : index
    %c0_0 = arith.constant 0 : index
    %0 = vector.load %arg2[%c0, %c0_0] : memref<80x128xf32, #tpu.memory_space<vmem>>, vector<32x16xf32>
    %c32 = arith.constant 32 : index
    %c0_1 = arith.constant 0 : index
    %1 = vector.load %arg2[%c32, %c0_1] : memref<80x128xf32, #tpu.memory_space<vmem>>, vector<32x1xf32>
    %c64 = arith.constant 64 : index
    %c0_2 = arith.constant 0 : index
    %2 = vector.load %arg2[%c64, %c0_2] : memref<80x128xf32, #tpu.memory_space<vmem>>, vector<4x32xf32>
    %c72 = arith.constant 72 : index
    %c0_3 = arith.constant 0 : index
    %3 = vector.load %arg2[%c72, %c0_3] : memref<80x128xf32, #tpu.memory_space<vmem>>, vector<4x1xf32>
    %c0_4 = arith.constant 0 : index
    %c0_5 = arith.constant 0 : index
    %4 = vector.load %arg1[%c0_4, %c0_5] : memref<16x256xf32, #tpu.memory_space<vmem>>, vector<16x256xf32>
    %cst = arith.constant dense<0.000000e+00> : vector<32x256xf32>
    %5 = tpu.matmul %0, %4, %cst {dimension_numbers = #tpu.dot_dimension_numbers<[1], [0], [0], [1], [0, 0, 1, 1], [], []>} : vector<32x16xf32>, vector<16x256xf32>, vector<32x256xf32> -> vector<32x256xf32>
    %6 = vector.broadcast %1 : vector<32x1xf32> to vector<32x256xf32>
    %7 = arith.addf %5, %6 : vector<32x256xf32>
    %cst_6 = arith.constant 0.000000e+00 : f32
    %8 = vector.broadcast %cst_6 : f32 to vector<32x256xf32>
    %9 = arith.maximumf %7, %8 : vector<32x256xf32>
    %cst_7 = arith.constant dense<0.000000e+00> : vector<4x256xf32>
    %10 = tpu.matmul %2, %9, %cst_7 {dimension_numbers = #tpu.dot_dimension_numbers<[1], [0], [0], [1], [0, 0, 1, 1], [], []>} : vector<4x32xf32>, vector<32x256xf32>, vector<4x256xf32> -> vector<4x256xf32>
    %11 = vector.broadcast %3 : vector<4x1xf32> to vector<4x256xf32>
    %12 = arith.addf %10, %11 : vector<4x256xf32>
    %c0_8 = arith.constant 0 : index
    %c0_9 = arith.constant 0 : index
    %13 = vector.load %arg3[%c0_8, %c0_9] : memref<4x256xf32, #tpu.memory_space<vmem>>, vector<4x256xf32>
    tpu.vector_store %arg3[%c0_8, %c0_9], %12 {strides = array<i32>} : memref<4x256xf32, #tpu.memory_space<vmem>>, vector<4x256xf32>,
    return
  }
  func.func @transform_0(%arg0: i32) -> (i32, i32) {
    %c0_i32 = arith.constant 0 : i32
    %c0_i32_0 = arith.constant 0 : i32
    return %c0_i32, %arg0 : i32, i32
  }
  func.func @transform_1(%arg0: i32) -> (i32, i32) {
    %c0_i32 = arith.constant 0 : i32
    %c0_i32_0 = arith.constant 0 : i32
    %c0_i32_1 = arith.constant 0 : i32
    return %c0_i32, %c0_i32_0 : i32, i32
  }
  func.func @transform_2(%arg0: i32) -> (i32, i32) {
    %c0_i32 = arith.constant 0 : i32
    %c0_i32_0 = arith.constant 0 : i32
    return %c0_i32, %arg0 : i32, i32
  }
}

</mosaic_0001>

<bundles_post_ra>
// kernel: forward.1
= control target key start
LH: loop header
LB: loop body
LE: loop exit
PB: predicated region body
PF: predicated region fallthrough
CT: control target
= control target key end

     0   :  { %7 = vsyncpa [#allocation3], 0  ;;  %s374_s0 = inlined_call_operand.hbm [shape: f32[16,256], index: 0, kind: input, shape index: {}]   ;;  %s375_s1 = inlined_call_operand.hbm [shape: f32[80,128], index: 1, kind: input, shape index: {}]   ;;  %s376_s2 = inlined_call_operand.hbm [shape: f32[4,256], index: 2, kind: output, shape index: {}]  }
   0x1   :  { %8 = vsyncpa [#allocation6], 0 }
   0x2   :  { %9 = vsyncpa [#allocation4], 0  ;;  %s14_s11 = sshll.u32 %s374_s0, 4  ;;  %s334_s12 = smov [#allocation2]   ;;  %s15_s11 = int_to_ptr.hbm [resolvable:$true] %s14_s11 }
   0x3   :  { %s16_s13 = sshll.u32 %s334_s12, 4  ;;  %s27_s16 = sshll.u32 %s375_s1, 4  ;;  %s17_s13 = int_to_ptr.vmem [resolvable:$true] %s16_s13  ;;  %s28_s16 = int_to_ptr.hbm [resolvable:$true] %s27_s16 }
   0x4   :  { %s335_s17 = smov 256   ;;  %s336_s18 = smov 16  }
   0x5   :  { %22 = dma.hbm_to_vmem [thread:$0]  %s15_s11, 512, %s17_s13, [#allocation3], %s335_s17, %s335_s17, %s336_s18  }
   0x6   :  { %s337_s19 = smov [#allocation5]   ;;  %s338_s21 = smov 128  }
   0x7   :  { %s29_s20 = sshll.u32 %s337_s19, 4  ;;  %s339_s22 = smov 8   ;;  %s30_s20 = int_to_ptr.vmem [resolvable:$true] %s29_s20 }
   0x8   :  { %35 = dma.hbm_to_vmem [thread:$0]  %s28_s16, 1280, %s30_s20, [#allocation6], %s338_s21, %s338_s21, %s339_s22  }
   0x9   :  { %328 = dma.done.wait [#allocation3], 512  }
   0xa   :  { %329 = vsyncadd [#allocation3], 4294966784 }
   0xb   :  { %330 = dma.done.wait [#allocation6], 1280  }
   0xc   :  { %331 = vsyncadd [#allocation6], 4294966016  ;;  %v340_v0 = vmov 0   ;;  %v56_v1 = vld [vmem:[#allocation2 + $0x10] sm:$0xff]  ;;  %v57_v2 = vld [vmem:[#allocation2 + $0x18] sm:$0xff]  ;;  %vm78_vm0 = vcmask 130048  }
   0xd   :  { %254 = vset.pattern.permute.xlu1 %v340_v0  ;;  %253 = vset.pattern.permute.xlu0 %v340_v0  ;;  %v54_v3 = vld [vmem:[#allocation2] sm:$0xff]  ;;  %v55_v4 = vld [vmem:[#allocation2 + $0x8] sm:$0xff]  ;;  %v47_v6 = vld [vmem:[#allocation5 + $0x18] sm:$0xff]  ;;  %vm162_vm1 = vcmask 261120   ;;  %s341_s0 = smov [#allocation7]   ;;  %s220_s25 = sshll.u32 %s376_s2, 4  ;;  %s221_s25 = int_to_ptr.hbm [resolvable:$true] %s220_s25 }
   0xe   :  { %255 = vset.pattern.permute.xlu2 %v340_v0  ;;  %105 = vmatpush.msra.mxu0 %v56_v1  ;;  %v44_v5 = vld [vmem:[#allocation5] sm:$0xff]  ;;  %v49_v7 = vld [vmem:[#allocation5 + $0x28] sm:$0xff]  ;;  %v51_v8 = vld [vmem:[#allocation5 + $0x38] sm:$0xff]  ;;  %s218_s1 = sshll.u32 %s341_s0, 4  ;;  %vm209_vm2 = vcmask 1043456   ;;  %s219_s1 = int_to_ptr.vmem [resolvable:$true] %s218_s1 }
   0xf   :  { %134 = vmatpush.msra.mxu1 %v57_v2  ;;  %241 = vmatpush.msra.mxu2 %v56_v1  ;;  %v45_v9 = vld [vmem:[#allocation5 + $0x8] sm:$0xff]  ;;  %v48_v10 = vld [vmem:[#allocation5 + $0x20] sm:$0xff]  ;;  %v50_v11 = vld [vmem:[#allocation5 + $0x30] sm:$0xff] }
  0x10   :  { %243 = vmatpush.msra.mxu3 %v57_v2  ;;  %106 = vmatpush.msra.mxu0 %v54_v3  ;;  %v46_v12 = vld [vmem:[#allocation5 + $0x10] sm:$0xff]  ;;  %v53_v13 = vld [vmem:[#allocation5 + $0x48] sm:$0xf]  ;;  %v52_v41 = vld [vmem:[#allocation5 + $0x40] sm:$0xf] }
  0x11   :  { %135 = vmatpush.msra.mxu1 %v55_v4  ;;  %231 = vmatmul.msk.f32.vlgmr.msra.gmra.mxu0 %vm78_vm0, %v44_v5 }
  0x12   :  { %235 = vmatmul.msk.f32.vlgmr.msra.gmra.mxu1 %vm78_vm0, %v44_v5  ;;  %242 = vmatpush.msra.mxu2 %v54_v3 }
  0x13   :  { %244 = vmatpush.msra.mxu3 %v55_v4  ;;  %234 = vmatmul.msk.f32.vlgmr.msra.gmra.mxu2 %vm78_vm0, %v47_v6 }
  0x14   :  { %238 = vmatmul.msk.f32.vlgmr.msra.gmra.mxu3 %vm78_vm0, %v47_v6  ;;  %65 = vperm.xlu1 %254, %v49_v7  }
  0x15   :  { %75 = vperm.xlu0 %253, %v51_v8   ;;  %159 = vperm.xlu2 %255, %v53_v13  }
  0x19   :  { %232 = vmatmul.msk.f32.gmra.mxu0 %vm78_vm0, %v45_v9 }
  0x1a   :  { %236 = vmatmul.msk.f32.gmra.mxu1 %vm78_vm0, %v45_v9 }
  0x1c   :  { %60 = vperm.xlu1 %254, %v48_v10  }
  0x1d   :  { %70 = vperm.xlu0 %253, %v50_v11  }
  0x21   :  { %233 = vmatmul.msk.f32.gmra.mxu0 %vm78_vm0, %v46_v12 }
  0x22   :  { %237 = vmatmul.msk.f32.gmra.mxu1 %vm78_vm0, %v46_v12 }
  0x6f   :  { %v160_v43 = vpop.permute.xlu2 %159 }
  0x86   :  { %v66_v17 = vpop.permute.xlu1 %65 }
  0x87   :  { %v76_v16 = vpop.permute.xlu0 %75 }
  0x8e   :  { %v108_v14 = vpop.f32.mrf.mxu0  ;;  %v61_v28 = vpop.permute.xlu1 %60 }
  0x8f   :  { %v137_v15 = vpop.f32.mrf.mxu1  ;;  %v71_v26 = vpop.permute.xlu0 %70  ;;  %v109_v34 = vadd.f32 %v108_v14, %v61_v28 }
  0x90   :  { %v138_v36 = vadd.f32 %v137_v15, %v61_v28 }
  0x91   :  { %v149_v40 = vmax.f32 %v109_v34, 0.0 }
  0x92   :  { %v150_v42 = vmax.f32 %v138_v36, 0.0 }
  0x96   :  { %v111_v18 = vpop.f32.mrf.mxu0  ;;  %v117_v19 = vpop.f32.mrf.mxu2 }
  0x97   :  { %v118_v20 = vadd.f32 %v117_v19, %v76_v16  ;;  %v140_v21 = vpop.f32.mrf.mxu1  ;;  %v146_v22 = vpop.f32.mrf.mxu3  ;;  %v112_v29 = vadd.f32 %v111_v18, %v66_v17 }
  0x98   :  { %v147_v23 = vadd.f32 %v146_v22, %v76_v16  ;;  %v141_v32 = vadd.f32 %v140_v21, %v66_v17 }
  0x99   :  { %v155_v24 = vmax.f32 %v118_v20, 0.0  ;;  %v151_v38 = vmax.f32 %v112_v29, 0.0 }
  0x9a   :  { %v156_v25 = vmax.f32 %v147_v23, 0.0  ;;  %v152_v39 = vmax.f32 %v141_v32, 0.0 }
  0x9b   :  { %178 = vmatpush.msrb.mxu2 %v155_v24 }
  0x9c   :  { %198 = vmatpush.msrb.mxu3 %v156_v25 }
  0x9e   :  { %v114_v27 = vpop.f32.mrf.mxu0 }
  0x9f   :  { %v115_v30 = vadd.f32 %v114_v27, %v71_v26  ;;  %v143_v31 = vpop.f32.mrf.mxu1 }
  0xa0   :  { %v144_v33 = vadd.f32 %v143_v31, %v71_v26 }
  0xa1   :  { %v153_v35 = vmax.f32 %v115_v30, 0.0 }
  0xa2   :  { %v154_v37 = vmax.f32 %v144_v33, 0.0 }
  0xa3   :  { %179 = vmatpush.msrb.mxu2 %v153_v35 }
  0xa4   :  { %199 = vmatpush.msrb.mxu3 %v154_v37 }
  0xa5   :  { %180 = vmatpush.msrb.mxu2 %v151_v38 }
  0xa6   :  { %200 = vmatpush.msrb.mxu3 %v152_v39 }
  0xa7   :  { %181 = vmatpush.msrb.mxu2 %v149_v40 }
  0xa8   :  { %201 = vmatpush.msrb.mxu3 %v150_v42  ;;  %239 = vmatmul.msk.f32.vlgmr.msrb.gmra.mxu2 %vm162_vm1, %v52_v41 }
  0xa9   :  { %240 = vmatmul.msk.f32.vlgmr.msrb.gmra.mxu3 %vm162_vm1, %v52_v41 }
 0x12b   :  { %v183_v45 = vpop.f32.mrf.mxu2 }
 0x12c   :  { %v203_v44 = vpop.f32.mrf.mxu3  ;;  %v184_v48 = vadd.f32 %v183_v45, %v160_v43 }
 0x12d   :  { %v204_v46 = vadd.f32 %v203_v44, %v160_v43 }
 0x12f   :  { %v208_v47 = vrot.slane %v204_v46, 4 }
 0x131   :  { %v210_v49 = vsel %vm209_vm2, %v184_v48, %v208_v47 }
 0x132   :  { %212 = vst [vmem:[#allocation7] sm:$0xff] %v210_v49 }
 0x133   :  { %223 = dma.vmem_to_hbm [thread:$0]  %s219_s1, 128, %s221_s25, [#allocation4]  }
 0x134   :  { %332 = dma.done.wait [#allocation4], 128  }
 0x135   :  { %333 = vsyncadd [#allocation4], 4294967168 }
 0x136   :  { %228 = vsyncpa [#allocation3], 1 }
 0x137   :  { %229 = vsyncpa [#allocation6], 1 }
 0x138   :  { %230 = vsyncpa [#allocation4], 1 }

</bundles_post_ra>
